<compile_context>
chip_gen: v7x
topology: tpu7x:2x2x1
jax: 0.10.0
libtpu: 0.0.40
codegen_flags: <defaults>
</compile_context>

<pallas_src>
import functools

import jax
import jax.numpy as jnp
from jax.experimental import pallas as pl
from jax.experimental.pallas import tpu as pltpu

# 32 MiB scoped VMEM: <= physical on v7x (64 MiB) and well under v5e/v6e (128 MiB).
_VMEM_LIMIT_BYTES = 32 * 1024 * 1024


def _round_up(x: int, m: int) -> int:
    return ((x + m - 1) // m) * m


# ----------------------------------------------------------------------------
# Fast path: frozen nn.init.eye_ weight -> out[:, :min(K, N)] = x[:, :min(K, N)],
# zero-fill the rest.  No weight stream, no MXU work.
# ----------------------------------------------------------------------------
def _identity_kernel(x_ref, o_ref):
    k = x_ref.shape[-1]
    n = o_ref.shape[-1]
    if n <= k:
        o_ref[...] = x_ref[:, :n]
    else:
        o_ref[...] = jnp.zeros(o_ref.shape, o_ref.dtype)
        o_ref[:, :k] = x_ref[...]


def generator_forward_identity(x, output_size, *, tm=512):
    """Forward pass assuming the weight is exactly nn.init.eye_ (frozen)."""
    m, k = x.shape
    n = output_size
    tm_e = m if m <= tm else max(8, (tm // 8) * 8)
    grid = (pl.cdiv(m, tm_e),)
    itemsize = jnp.dtype(x.dtype).itemsize
    return pl.pallas_call(
        _identity_kernel,
        out_shape=jax.ShapeDtypeStruct((m, n), x.dtype),
        grid=grid,
        in_specs=[pl.BlockSpec((tm_e, k), lambda i: (i, 0))],
        out_specs=pl.BlockSpec((tm_e, n), lambda i: (i, 0)),
        compiler_params=pltpu.CompilerParams(
            dimension_semantics=("parallel",),
            vmem_limit_bytes=_VMEM_LIMIT_BYTES,
        ),
        cost_estimate=pl.CostEstimate(
            flops=0, transcendentals=0,
            bytes_accessed=itemsize * (m * k + m * n)),
    )(x)


# ----------------------------------------------------------------------------
# General (trainable-weight) path: tiled matmul, K-last reduction.
# ----------------------------------------------------------------------------
def _matmul_kernel_accout(x_ref, wt_ref, o_ref, *, compute_dtype):
    # float32 output: accumulate directly into the (K-resident) output block.
    kk = pl.program_id(2)

    @pl.when(kk == 0)
    def _init():
        o_ref[...] = jnp.zeros_like(o_ref)

    o_ref[...] += jnp.dot(x_ref[...].astype(compute_dtype),
                          wt_ref[...].astype(compute_dtype),
                          preferred_element_type=jnp.float32)


def _matmul_kernel_scratch(x_ref, wt_ref, o_ref, acc_ref, *, compute_dtype):
    # Non-f32 output: accumulate in an f32 VMEM scratch, cast on the last K step.
    kk = pl.program_id(2)

    @pl.when(kk == 0)
    def _init():
        acc_ref[...] = jnp.zeros_like(acc_ref)

    acc_ref[...] += jnp.dot(x_ref[...].astype(compute_dtype),
                            wt_ref[...].astype(compute_dtype),
                            preferred_element_type=jnp.float32)

    @pl.when(kk == pl.num_programs(2) - 1)
    def _finalize():
        o_ref[...] = acc_ref[...].astype(o_ref.dtype)


def generator_forward(x, wt, *, tm=512, tn=512, tk=512, compute_dtype=None):
    """Equivalent of Generator.forward: x @ W.T.

    x:  [batch, input_size]
    wt: [input_size, output_size]   (pre-transposed weight, W.T)
    returns [batch, output_size]

    compute_dtype: None -> use x.dtype (exact). On v6e/v7x pass jnp.bfloat16 for
    up to ~4x MXU rate on the trained-weight path (f32 accumulation is kept).
    """
    m, k = x.shape
    k2, n = wt.shape
    assert k == k2, "weight / input feature-dim mismatch"
    out_dtype = x.dtype
    if compute_dtype is None:
        compute_dtype = x.dtype

    # Tile selection: full-extent blocks for small dims (no padding, (8,128) rule
    # is satisfied by full-dim blocks); otherwise aligned tiles with ragged M/N
    # edge blocks handled by Pallas (edge writes are masked).
    tm_e = m if m <= tm else max(8, (tm // 8) * 8)
    tn_e = n if n <= tn else max(128, (tn // 128) * 128)
    tk_e = k if k <= tk else max(128, (tk // 128) * 128)

    # v7x megacore: make sure at least one "parallel" axis has >= 2 blocks so
    # both TensorCores get work (no-op on single-TC v5e/v6e).
    if pl.cdiv(m, tm_e) == 1 and pl.cdiv(n, tn_e) == 1:
        if n >= 256:
            tn_e = _round_up(pl.cdiv(n, 2), 128)
        elif m >= 16:
            tm_e = _round_up(pl.cdiv(m, 2), 8)

    # Zero-pad K only if the reduction axis is tiled unevenly (numerically
    # required -- adds exact zeros to the accumulation).  M/N are never padded.
    kp = _round_up(k, tk_e)
    if kp != k:
        x = jnp.pad(x, ((0, 0), (0, kp - k)))
        wt = jnp.pad(wt, ((0, kp - k), (0, 0)))

    gm, gn, gk = pl.cdiv(m, tm_e), pl.cdiv(n, tn_e), kp // tk_e
    grid = (gm, gn, gk)

    if out_dtype == jnp.float32:
        kernel = functools.partial(_matmul_kernel_accout, compute_dtype=compute_dtype)
        scratch_shapes = ()
    else:
        kernel = functools.partial(_matmul_kernel_scratch, compute_dtype=compute_dtype)
        scratch_shapes = (pltpu.VMEM((tm_e, tn_e), jnp.float32),)

    x_item = jnp.dtype(x.dtype).itemsize
    w_item = jnp.dtype(wt.dtype).itemsize
    o_item = jnp.dtype(out_dtype).itemsize
    bytes_accessed = (x_item * m * kp * gn      # x re-streamed once per N tile
                      + w_item * kp * n * gm    # wt re-streamed once per M tile
                      + o_item * m * n)

    return pl.pallas_call(
        kernel,
        out_shape=jax.ShapeDtypeStruct((m, n), out_dtype),
        grid=grid,
        in_specs=[
            pl.BlockSpec((tm_e, tk_e), lambda i, j, kk: (i, kk)),
            pl.BlockSpec((tk_e, tn_e), lambda i, j, kk: (kk, j)),
        ],
        out_specs=pl.BlockSpec((tm_e, tn_e), lambda i, j, kk: (i, j)),
        scratch_shapes=scratch_shapes,
        compiler_params=pltpu.CompilerParams(
            dimension_semantics=("parallel", "parallel", "arbitrary"),
            vmem_limit_bytes=_VMEM_LIMIT_BYTES,
        ),
        cost_estimate=pl.CostEstimate(
            flops=2 * m * n * kp,
            transcendentals=0,
            bytes_accessed=bytes_accessed),
    )(x, wt)


def make_generator_params(input_size, output_size, dtype=jnp.float32):
    """nn.init.eye_(weight) with weight [out, in], stored pre-transposed as
    W.T = eye(input_size, output_size) so the forward never transposes in HBM."""
    return jnp.eye(input_size, output_size, dtype=dtype)


# TODO(synk): Generator.save / Generator.load are host-side checkpoint I/O with no
# Pallas equivalent; only forward() is implemented here.

if __name__ == "__main__":
    # Small shapes consistent with the module: Linear(input_size -> output_size).
    batch, input_size, output_size = 8, 32, 48

    key = jax.random.PRNGKey(0)
    x = jax.random.normal(key, (batch, input_size), dtype=jnp.float32)
    wt = make_generator_params(input_size, output_size)  # [K, N] = W.T (identity init)

    # Exact reference for the eye_-initialized weight: zero-padded copy of x.
    ref = jnp.concatenate(
        [x, jnp.zeros((batch, output_size - input_size), x.dtype)], axis=1)

    # 1) General (trainable-weight) matmul path.
    y = jax.block_until_ready(generator_forward(x, wt))
    assert y.shape == (batch, output_size)
    assert jnp.allclose(y, ref, atol=1e-5), "matmul path mismatch vs reference"

    # 2) Frozen-identity fast path (no weight read, no MXU work).
    y_id = jax.block_until_ready(generator_forward_identity(x, output_size))
    assert jnp.allclose(y_id, ref, atol=1e-6), "identity path mismatch vs reference"

    # 3) Exercise the tiled path (ragged N edge, K padding, K-axis accumulation)
    #    with a general (non-identity) weight.
    k1, k2 = jax.random.split(jax.random.PRNGKey(1))
    x2 = jax.random.normal(k1, (64, 300), dtype=jnp.float32)
    wt2 = jax.random.normal(k2, (300, 200), dtype=jnp.float32) * 0.05
    y2 = jax.block_until_ready(generator_forward(x2, wt2, tm=64, tn=128, tk=128))
    ref2 = jnp.dot(x2, wt2, precision=jax.lax.Precision.HIGHEST)
    assert jnp.allclose(y2, ref2, atol=1e-4, rtol=1e-4), "tiled path mismatch"

    print("KERNEL_OK")
</pallas_src>

<mosaic_0001>
module attributes {stable_mosaic.version = 11 : i64} {
  func.func @_matmul_kernel_accout(%arg0: i32, %arg1: i32, %arg2: i32, %arg3: memref<8x32xf32, #tpu.memory_space<vmem>>, %arg4: memref<32x48xf32, #tpu.memory_space<vmem>>, %arg5: memref<8x48xf32, #tpu.memory_space<vmem>>) attributes {dimension_semantics = [#tpu.dimension_semantics<parallel>, #tpu.dimension_semantics<parallel>, #tpu.dimension_semantics<arbitrary>], iteration_bounds = array<i64: 1, 1, 1>, scalar_prefetch = 0 : i64, scratch_operands = 0 : i64, tpu.core_type = #tpu.core_type<tc>, window_params = [{transform_indices = @transform_0, window_bounds = array<i64: 8, 32>}, {transform_indices = @transform_1, window_bounds = array<i64: 32, 48>}, {transform_indices = @transform_2, window_bounds = array<i64: 8, 48>}]} {
    %c0_i32 = arith.constant 0 : i32
    %0 = arith.cmpi eq, %arg2, %c0_i32 : i32
    %1 = arith.extui %0 : i1 to i32
    %c0_i32_0 = arith.constant 0 : i32
    %2 = arith.cmpi ne, %1, %c0_i32_0 : i32
    scf.if %2 {
      %cst_8 = arith.constant 0.000000e+00 : f32
      %9 = vector.broadcast %cst_8 : f32 to vector<8x48xf32>
      %c0_9 = arith.constant 0 : index
      %c0_10 = arith.constant 0 : index
      %10 = vector.load %arg5[%c0_9, %c0_10] : memref<8x48xf32, #tpu.memory_space<vmem>>, vector<8x48xf32>
      tpu.vector_store %arg5[%c0_9, %c0_10], %9 {strides = array<i32>} : memref<8x48xf32, #tpu.memory_space<vmem>>, vector<8x48xf32>,
    } else {
    }
    %c0 = arith.constant 0 : index
    %c0_1 = arith.constant 0 : index
    %3 = vector.load %arg5[%c0, %c0_1] : memref<8x48xf32, #tpu.memory_space<vmem>>, vector<8x48xf32>
    %c0_2 = arith.constant 0 : index
    %c0_3 = arith.constant 0 : index
    %4 = vector.load %arg3[%c0_2, %c0_3] : memref<8x32xf32, #tpu.memory_space<vmem>>, vector<8x32xf32>
    %c0_4 = arith.constant 0 : index
    %c0_5 = arith.constant 0 : index
    %5 = vector.load %arg4[%c0_4, %c0_5] : memref<32x48xf32, #tpu.memory_space<vmem>>, vector<32x48xf32>
    %cst = arith.constant dense<0.000000e+00> : vector<8x48xf32>
    %6 = tpu.matmul %4, %5, %cst {dimension_numbers = #tpu.dot_dimension_numbers<[1], [0], [0], [1], [0, 0, 1, 1], [], []>} : vector<8x32xf32>, vector<32x48xf32>, vector<8x48xf32> -> vector<8x48xf32>
    %7 = arith.addf %3, %6 : vector<8x48xf32>
    %c0_6 = arith.constant 0 : index
    %c0_7 = arith.constant 0 : index
    %8 = vector.load %arg5[%c0_6, %c0_7] : memref<8x48xf32, #tpu.memory_space<vmem>>, vector<8x48xf32>
    tpu.vector_store %arg5[%c0_6, %c0_7], %7 {strides = array<i32>} : memref<8x48xf32, #tpu.memory_space<vmem>>, vector<8x48xf32>,
    return
  }
  func.func @transform_0(%arg0: i32, %arg1: i32, %arg2: i32) -> (i32, i32) {
    %c0_i32 = arith.constant 0 : i32
    return %arg0, %arg2 : i32, i32
  }
  func.func @transform_1(%arg0: i32, %arg1: i32, %arg2: i32) -> (i32, i32) {
    %c0_i32 = arith.constant 0 : i32
    return %arg2, %arg1 : i32, i32
  }
  func.func @transform_2(%arg0: i32, %arg1: i32, %arg2: i32) -> (i32, i32) {
    %c0_i32 = arith.constant 0 : i32
    return %arg0, %arg1 : i32, i32
  }
}

</mosaic_0001>

<bundles_post_ra>
// kernel: tpu_custom_call.1
= control target key start
LH: loop header
LB: loop body
LE: loop exit
PB: predicated region body
PF: predicated region fallthrough
CT: control target
= control target key end

     0   :  { %7 = vsyncpa [#allocation3], 0  ;;  %s314_s0 = inlined_call_operand.hbm [shape: f32[8,32], index: 0, kind: input, shape index: {}]   ;;  %s315_s1 = inlined_call_operand.hbm [shape: f32[32,48], index: 1, kind: input, shape index: {}]   ;;  %s316_s2 = inlined_call_operand.hbm [shape: f32[8,48], index: 2, kind: output, shape index: {}]  }
   0x1   :  { %8 = vsyncpa [#allocation6], 0 }
   0x2   :  { %9 = vsyncpa [#allocation4], 0  ;;  %s246_s9 = smov [#allocation2]   ;;  %s247_s11 = smov [#allocation5]  }
   0x3   :  { %s16_s10 = sshll.u32 %s246_s9, 4  ;;  %s25_s12 = sshll.u32 %s247_s11, 4  ;;  %s17_s10 = int_to_ptr.vmem [resolvable:$true] %s16_s10  ;;  %s269_s12 = int_to_ptr.vmem [resolvable:$true] %s25_s12 }
   0x4   :  { %s174_s15 = scalar_lea.hbm %s314_s0, 128 }
   0x5   :  { %p175_p0 = scmp.ne.s32.totalorder %s314_s0, %s174_s15  ;;  %p178_p1 = scmp.lt.u32.totalorder %s174_s15, %s314_s0 }
   0x7   :  { %p180_p2 = pnand %p178_p1, %p175_p0 }
   0x9   :  { %183 = shalt.err (!%p180_p2)
}
   0xa   :  { %s184_s20 = scalar_lea.vmem %s17_s10, 128  ;;  %p189_p4 = scmp.lt.s32.totalorder %s17_s10, %s17_s10 }
   0xb   :  { %p185_p3 = scmp.ne.s32.totalorder %s17_s10, %s184_s20  ;;  %p190_p5 = scmp.lt.s32.totalorder %s184_s20, %s184_s20 }
   0xd   :  { %p191_p6 = por %p190_p5, %p189_p4 }
   0xf   :  { %p192_p7 = pnand %p191_p6, %p185_p3 }
  0x11   :  { %195 = shalt.err (!%p192_p7)
}
  0x12   :  { %19 = dma.hbm_to_vmem [thread:$0]  %s314_s0, 128, %s17_s10, [#allocation3]  }
  0x13   :  { %s196_s25 = scalar_lea.hbm %s315_s1, 512 }
  0x14   :  { %p197_p8 = scmp.ne.s32.totalorder %s315_s1, %s196_s25  ;;  %p200_p9 = scmp.lt.u32.totalorder %s196_s25, %s315_s1 }
  0x16   :  { %p202_p10 = pnand %p200_p9, %p197_p8 }
  0x18   :  { %205 = shalt.err (!%p202_p10)
}
  0x19   :  { %s206_s30 = scalar_lea.vmem %s269_s12, 512  ;;  %p211_p12 = scmp.lt.s32.totalorder %s269_s12, %s269_s12 }
  0x1a   :  { %p207_p11 = scmp.ne.s32.totalorder %s269_s12, %s206_s30  ;;  %p212_p13 = scmp.lt.s32.totalorder %s206_s30, %s206_s30 }
  0x1c   :  { %p213_p0 = por %p212_p13, %p211_p12 }
  0x1e   :  { %p214_p1 = pnand %p213_p0, %p207_p11 }
  0x20   :  { %217 = shalt.err (!%p214_p1)
}
  0x21   :  { %s248_s0 = smov 128   ;;  %s249_s3 = smov 8  }
  0x22   :  { %31 = dma.hbm_to_vmem [thread:$0]  %s315_s1, 512, %s269_s12, [#allocation6], %s248_s0, %s248_s0, %s249_s3  }
  0x23   :  { %240 = dma.done.wait [#allocation3], 128  }
  0x24   :  { %241 = vsyncadd [#allocation3], 4294967168 }
  0x25   :  { %242 = dma.done.wait [#allocation6], 512  }
  0x26   :  { %243 = vsyncadd [#allocation6], 4294966784  ;;  %vm42_vm0 = vcmask 392192   ;;  %v250_v0 = vmov 0.0|0.0   ;;  %v251_v1 = vmov 0.0   ;;  %vm252_vm1 = vmmov 0  }
  0x27   :  { %160 = vmatprep.subr.bf16.mxu0 %v250_v0  ;;  %43 = vst.msk [vmem:[#allocation7] sm:$0xff] %vm42_vm0, %v251_v1  ;;  %157 = vmatprep.mubr.msk.f32.mxu0 %vm252_vm1, %v251_v1  ;;  %v46_v2 = vld [vmem:[#allocation5] sm:$0xff]  ;;  %v47_v3 = vld [vmem:[#allocation5 + $0x8] sm:$0xff]  ;;  %v48_v4 = vld [vmem:[#allocation5 + $0x10] sm:$0xff]  ;;  %vm50_vm2 = vcmask 261120   ;;  %s253_s1 = smov [#allocation7]  }
  0x28   :  { %v161_v5 = vpack.c.bf16 %v47_v3, %v46_v2  ;;  %v49_v6 = vld [vmem:[#allocation5 + $0x18] sm:$0xff]  ;;  %s133_s6 = sshll.u32 %s253_s1, 4  ;;  %s134_s6 = int_to_ptr.vmem [resolvable:$true] %s133_s6 }
  0x29   :  { %v164_v7 = vpack.c.bf16 %v49_v6, %v48_v4  ;;  %v45_v8 = vld [vmem:[#allocation2] sm:$0xff]  ;;  %s218_s7 = scalar_lea.vmem %s134_s6, 128  ;;  %p223_p3 = scmp.lt.s32.totalorder %s134_s6, %s134_s6 }
  0x2a   :  { %162 = vmatpush3.bf16.msra.mxu0 %v161_v5  ;;  %p219_p2 = scmp.ne.s32.totalorder %s134_s6, %s218_s7  ;;  %p224_p4 = scmp.lt.s32.totalorder %s218_s7, %s218_s7 }
  0x2b   :  { %163 = vmatprep.subr.bf16.mxu0 %v250_v0 }
  0x2c   :  { %p225_p5 = por %p224_p4, %p223_p3 }
  0x2e   :  { %165 = vmatpush3.bf16.msra.mxu0 %v164_v7  ;;  %v44_v9 = vld [vmem:[#allocation7] sm:$0xff]  ;;  %p226_p6 = pnand %p225_p5, %p219_p2 }
  0x31   :  { %158 = vmatmul.mubr.msk.f32.vlgmr.msra.gmra.mrb[0].mxu0 %vm50_vm2, %v45_v8 }
 0x104   :  { %v120_v10 = vpop.f32.mrb[0].mxu0 }
 0x105   :  { %v124_v11 = vadd.f32 %v120_v10, %v44_v9  ;;  %v159_v12 = vpop.f32.mrb[1].mxu0 }
 0x107   :  { %126 = vst.msk [vmem:[#allocation7] sm:$0xff] %vm42_vm0, %v124_v11 }
 0x108   :  { %229 = shalt.err (!%p226_p6)
}
 0x109   :  { %s230_s10 = scalar_lea.hbm %s316_s2, 128 }
 0x10a   :  { %p231_p7 = scmp.ne.s32.totalorder %s316_s2, %s230_s10  ;;  %p234_p8 = scmp.lt.u32.totalorder %s230_s10, %s316_s2 }
 0x10c   :  { %p236_p9 = pnand %p234_p8, %p231_p7 }
 0x10e   :  { %239 = shalt.err (!%p236_p9)
}
 0x10f   :  { %136 = dma.vmem_to_hbm [thread:$0]  %s134_s6, 128, %s316_s2, [#allocation4]  }
 0x110   :  { %244 = dma.done.wait [#allocation4], 128  }
 0x111   :  { %245 = vsyncadd [#allocation4], 4294967168 }
 0x112   :  { %140 = vsyncpa [#allocation3], 1 }
 0x113   :  { %141 = vsyncpa [#allocation6], 1 }
 0x114   :  { %142 = vsyncpa [#allocation4], 1 }

</bundles_post_ra>
